<compile_context>
chip_gen: v7x
topology: tpu7x:2x2x1
jax: 0.10.0
libtpu: 0.0.40
codegen_flags: <defaults>
</compile_context>

<pallas_src>
import functools

import jax
import jax.numpy as jnp
from jax.experimental import pallas as pl
from jax.experimental.pallas import tpu as pltpu

HIDDEN = 70            # logical hidden size of the PyTorch module
HIDDEN_PAD = 128       # lane-padded hidden size used by the kernels
LEAKY_SLOPE = 0.01     # nn.LeakyReLU default
BN_EPS = 1e-5          # nn.BatchNorm1d default
DEFAULT_TILE_B = 2048  # rows per batch tile (kept a multiple of 128)


def _leaky_relu(x):
    return jnp.where(x > 0, x, LEAKY_SLOPE * x)


def _round_up(x, m):
    return ((x + m - 1) // m) * m


def _hidden_stack(z, w1_ref, b1_ref, w2_ref, b2_ref, w3_ref, b3_ref):
    """Linear -> LeakyReLU x3. Matmuls in the weights' dtype (bf16), f32 accumulate/elementwise."""
    mm_dtype = w1_ref.dtype
    h = jnp.dot(z.astype(mm_dtype), w1_ref[...],
                preferred_element_type=jnp.float32) + b1_ref[...]
    h = _leaky_relu(h)
    h = jnp.dot(h.astype(mm_dtype), w2_ref[...],
                preferred_element_type=jnp.float32) + b2_ref[...]
    h = _leaky_relu(h)
    h = jnp.dot(h.astype(mm_dtype), w3_ref[...],
                preferred_element_type=jnp.float32) + b3_ref[...]
    h = _leaky_relu(h)
    return h  # (tile_b, HIDDEN_PAD) float32


def _stats_kernel(z_ref, w1_ref, b1_ref, w2_ref, b2_ref, w3_ref, b3_ref,
                  stats_ref, *, n_rows):
    """Pass 1: per-tile BatchNorm partial statistics (per-feature sum and sum-of-squares)."""
    i = pl.program_id(0)
    tile_b = z_ref.shape[0]
    h = _hidden_stack(z_ref[...], w1_ref, b1_ref, w2_ref, b2_ref, w3_ref, b3_ref)
    if n_rows % tile_b != 0:
        # Mask zero-padded batch rows out of the statistics (bias terms make them nonzero).
        row = jax.lax.broadcasted_iota(jnp.int32, h.shape, 0) + i * tile_b
        h = jnp.where(row < n_rows, h, 0.0)
    # NOTE: E[x^2] - mean^2 in f32 can cancel for huge batches / large activations; acceptable
    # here (guarded by max(., 0) + eps).  Use a shifted / Welford merge if BN accuracy matters.
    stats_ref[0, 0:1, :] = jnp.sum(h, axis=0, keepdims=True)
    stats_ref[0, 1:2, :] = jnp.sum(h * h, axis=0, keepdims=True)


def _output_kernel(z_ref, w1_ref, b1_ref, w2_ref, b2_ref, w3_ref, b3_ref,
                   w4eff_ref, b4eff_ref, out_ref):
    """Pass 2: recompute the MLP, apply the folded BN + final Linear, lane-dense (1, tile_b) out."""
    h = _hidden_stack(z_ref[...], w1_ref, b1_ref, w2_ref, b2_ref, w3_ref, b3_ref)
    tile_b = h.shape[0]
    # y = h @ w4_eff computed as an NT matmul so the result is already a lane-dense row,
    # avoiding a (tile_b, 1) column and the sublane->lane relayout it would need.
    y8 = jax.lax.dot_general(
        w4eff_ref[...], h,
        dimension_numbers=(((1,), (1,)), ((), ())),
        preferred_element_type=jnp.float32)          # (8, tile_b); all rows identical
    out_ref[...] = (y8[0:1, :] + b4eff_ref[0]).reshape(1, 1, tile_b)


def property_predictor(z, params, *, tile_b=DEFAULT_TILE_B):
    """z: (B, input_size) float32. params: dict from prepare_params(). Returns (B, 1) float32."""
    b_rows, d_in = z.shape
    hidden_pad = params["w1"].shape[1]
    mm_dtype = params["w1"].dtype

    # Batch tile: multiple of 128 so the pass-2 output row stays unmasked-vst / DMA friendly.
    tile_b = max(128, min(_round_up(tile_b, 128), _round_up(b_rows, 128)))
    padded_b = _round_up(b_rows, tile_b)
    nb = padded_b // tile_b

    z = z.astype(mm_dtype)                      # bf16 at the boundary halves z HBM traffic
    if padded_b != b_rows:
        z = jnp.pad(z, ((0, padded_b - b_rows), (0, 0)))

    mlp_args = (params["w1"], params["b1"], params["w2"], params["b2"],
                params["w3"], params["b3"])
    z_spec = pl.BlockSpec((tile_b, d_in), lambda i: (i, 0))
    const_map = lambda i: (0, 0)
    mlp_specs = [pl.BlockSpec(a.shape, const_map) for a in mlp_args]  # VMEM-resident weights
    cparams = pltpu.CompilerParams(dimension_semantics=("parallel",),
                                   vmem_limit_bytes=32 * 1024 * 1024)

    # ---- Pass 1 (batch-parallel): per-tile BN partial statistics ------------------------------
    stats = pl.pallas_call(
        functools.partial(_stats_kernel, n_rows=b_rows),
        out_shape=jax.ShapeDtypeStruct((nb, 2, hidden_pad), jnp.float32),
        grid_spec=pltpu.PrefetchScalarGridSpec(
            num_scalar_prefetch=0,
            grid=(nb,),
            in_specs=[z_spec] + mlp_specs,
            out_specs=pl.BlockSpec((1, 2, hidden_pad), lambda i: (i, 0, 0)),
        ),
        compiler_params=cparams,
    )(z, *mlp_args)

    # ---- Tiny plain-JAX fold: stats -> BN scale/shift -> folded final linear ------------------
    tot = jnp.sum(stats, axis=0)                                # (2, hidden_pad)
    mean = tot[0] / b_rows
    var = jnp.maximum(tot[1] / b_rows - mean * mean, 0.0)       # biased var (training mode)
    scale = params["gamma"].reshape(-1) * jax.lax.rsqrt(var + BN_EPS)
    shift = params["beta"].reshape(-1) - mean * scale
    w4col = params["w4col"]                                     # (hidden_pad,) f32
    w4_eff = jnp.broadcast_to((scale * w4col)[None, :],
                              (8, hidden_pad)).astype(jnp.float32)
    b4_eff = (params["b4"][0] + jnp.dot(shift, w4col)).reshape(1).astype(jnp.float32)

    # ---- Pass 2 (batch-parallel): recompute MLP, folded BN + Linear, lane-dense output --------
    out_rows = pl.pallas_call(
        _output_kernel,
        out_shape=jax.ShapeDtypeStruct((nb, 1, tile_b), jnp.float32),
        grid_spec=pltpu.PrefetchScalarGridSpec(
            num_scalar_prefetch=0,
            grid=(nb,),
            in_specs=[z_spec] + mlp_specs + [
                pl.BlockSpec((8, hidden_pad), const_map),
                pl.BlockSpec(memory_space=pltpu.MemorySpace.SMEM),   # scalar folded bias
            ],
            out_specs=pl.BlockSpec((1, 1, tile_b), lambda i: (i, 0, 0)),
        ),
        compiler_params=cparams,
    )(z, *mlp_args, w4_eff, b4_eff)

    return out_rows.reshape(padded_b, 1)[:b_rows]


def init_raw_params(key, input_size, hidden=HIDDEN):
    """Unpadded f32 params, PyTorch-style uniform fan-in init (deterministic)."""
    ks = jax.random.split(key, 8)

    def linear(kw, kb, fan_in, fan_out):
        bound = 1.0 / (fan_in ** 0.5)
        w = jax.random.uniform(kw, (fan_in, fan_out), jnp.float32, -bound, bound)
        b = jax.random.uniform(kb, (1, fan_out), jnp.float32, -bound, bound)
        return w, b

    w1, b1 = linear(ks[0], ks[1], input_size, hidden)
    w2, b2 = linear(ks[2], ks[3], hidden, hidden)
    w3, b3 = linear(ks[4], ks[5], hidden, hidden)
    w4, b4 = linear(ks[6], ks[7], hidden, 1)
    return dict(w1=w1, b1=b1, w2=w2, b2=b2, w3=w3, b3=b3,
                gamma=jnp.ones((1, hidden), jnp.float32),
                beta=jnp.zeros((1, hidden), jnp.float32),
                w4=w4, b4=b4)


def prepare_params(raw, hidden_pad=HIDDEN_PAD, matmul_dtype=jnp.bfloat16):
    """Zero-pad hidden dims 70->128 lanes and cast the MLP matmul weights to bf16 (pass
    matmul_dtype=jnp.float32 for full-f32 compute).  Padded feature columns stay exactly 0 through
    the MLP and the BN fold, so the forward output is unchanged."""
    def pad2(a, rows, cols):
        return jnp.pad(a, ((0, rows - a.shape[0]), (0, cols - a.shape[1])))

    d_in, hidden = raw["w1"].shape
    return dict(
        w1=pad2(raw["w1"], d_in, hidden_pad).astype(matmul_dtype),
        b1=pad2(raw["b1"], 1, hidden_pad),
        w2=pad2(raw["w2"], hidden_pad, hidden_pad).astype(matmul_dtype),
        b2=pad2(raw["b2"], 1, hidden_pad),
        w3=pad2(raw["w3"], hidden_pad, hidden_pad).astype(matmul_dtype),
        b3=pad2(raw["b3"], 1, hidden_pad),
        gamma=pad2(raw["gamma"], 1, hidden_pad),
        beta=pad2(raw["beta"], 1, hidden_pad),
        w4col=jnp.pad(raw["w4"][:, 0], (0, hidden_pad - hidden)).astype(jnp.float32),
        b4=raw["b4"].reshape(-1).astype(jnp.float32),     # (1,)
    )


def reference(z, raw, matmul_dtype=jnp.bfloat16):
    """Plain-JAX reference with the kernel's mixed-precision policy:
    bf16 MLP matmuls with f32 accumulation; BatchNorm and the final Linear in f32."""
    def mm(a, w):
        return jnp.dot(a.astype(matmul_dtype), w.astype(matmul_dtype),
                       preferred_element_type=jnp.float32)

    h = _leaky_relu(mm(z, raw["w1"]) + raw["b1"])
    h = _leaky_relu(mm(h, raw["w2"]) + raw["b2"])
    h = _leaky_relu(mm(h, raw["w3"]) + raw["b3"])
    mean = jnp.mean(h, axis=0, keepdims=True)
    var = jnp.mean((h - mean) ** 2, axis=0, keepdims=True)        # biased (training mode)
    h = (h - mean) * jax.lax.rsqrt(var + BN_EPS) * raw["gamma"] + raw["beta"]
    return jnp.dot(h, raw["w4"]) + raw["b4"]


if __name__ == "__main__":
    key = jax.random.PRNGKey(0)
    k_param, k_x, k_x2 = jax.random.split(key, 3)

    batch, input_size = 20, 32
    raw = init_raw_params(k_param, input_size)
    params = prepare_params(raw)

    # Single-tile path (20 rows -> one 128-row tile; padded tail rows masked out of the BN stats).
    z = jax.random.normal(k_x, (batch, input_size), jnp.float32)
    ref = reference(z, raw)
    out = jax.block_until_ready(property_predictor(z, params))
    assert out.shape == (batch, 1), out.shape
    assert jnp.allclose(out, ref, atol=1e-2, rtol=1e-2), float(jnp.max(jnp.abs(out - ref)))

    # Multi-tile path (3 batch tiles of 128 rows) — exercises the cross-tile two-pass BatchNorm.
    batch2 = 333
    z2 = jax.random.normal(k_x2, (batch2, input_size), jnp.float32)
    ref2 = reference(z2, raw)
    out2 = jax.block_until_ready(property_predictor(z2, params, tile_b=128))
    assert out2.shape == (batch2, 1), out2.shape
    assert jnp.allclose(out2, ref2, atol=1e-2, rtol=1e-2), float(jnp.max(jnp.abs(out2 - ref2)))

    print("KERNEL_OK")
</pallas_src>

<mosaic_0001>
module attributes {stable_mosaic.version = 11 : i64} {
  func.func @_stats_kernel(%arg0: i32, %arg1: memref<128x32xbf16, #tpu.memory_space<vmem>>, %arg2: memref<32x128xbf16, #tpu.memory_space<vmem>>, %arg3: memref<1x128xf32, #tpu.memory_space<vmem>>, %arg4: memref<128x128xbf16, #tpu.memory_space<vmem>>, %arg5: memref<1x128xf32, #tpu.memory_space<vmem>>, %arg6: memref<128x128xbf16, #tpu.memory_space<vmem>>, %arg7: memref<1x128xf32, #tpu.memory_space<vmem>>, %arg8: memref<1x2x128xf32, #tpu.memory_space<vmem>>) attributes {dimension_semantics = [#tpu.dimension_semantics<parallel>], iteration_bounds = array<i64: 1>, scalar_prefetch = 0 : i64, scratch_operands = 0 : i64, tpu.core_type = #tpu.core_type<tc>, window_params = [{transform_indices = @transform_0, window_bounds = array<i64: 128, 32>}, {pipeline_mode = #tpu.pipeline_mode<synchronous>, transform_indices = @transform_1, window_bounds = array<i64: 32, 128>}, {pipeline_mode = #tpu.pipeline_mode<synchronous>, transform_indices = @transform_2, window_bounds = array<i64: 1, 128>}, {pipeline_mode = #tpu.pipeline_mode<synchronous>, transform_indices = @transform_3, window_bounds = array<i64: 128, 128>}, {pipeline_mode = #tpu.pipeline_mode<synchronous>, transform_indices = @transform_4, window_bounds = array<i64: 1, 128>}, {pipeline_mode = #tpu.pipeline_mode<synchronous>, transform_indices = @transform_5, window_bounds = array<i64: 128, 128>}, {pipeline_mode = #tpu.pipeline_mode<synchronous>, transform_indices = @transform_6, window_bounds = array<i64: 1, 128>}, {transform_indices = @transform_7, window_bounds = array<i64: 1, 2, 128>}]} {
    %c0 = arith.constant 0 : index
    %c0_0 = arith.constant 0 : index
    %0 = vector.load %arg1[%c0, %c0_0] : memref<128x32xbf16, #tpu.memory_space<vmem>>, vector<128x32xbf16>
    %c0_1 = arith.constant 0 : index
    %c0_2 = arith.constant 0 : index
    %1 = vector.load %arg2[%c0_1, %c0_2] : memref<32x128xbf16, #tpu.memory_space<vmem>>, vector<32x128xbf16>
    %cst = arith.constant dense<0.000000e+00> : vector<128x128xf32>
    %2 = tpu.matmul %0, %1, %cst {dimension_numbers = #tpu.dot_dimension_numbers<[1], [0], [0], [1], [0, 0, 1, 1], [], []>} : vector<128x32xbf16>, vector<32x128xbf16>, vector<128x128xf32> -> vector<128x128xf32>
    %c0_3 = arith.constant 0 : index
    %c0_4 = arith.constant 0 : index
    %3 = vector.load %arg3[%c0_3, %c0_4] : memref<1x128xf32, #tpu.memory_space<vmem>>, vector<1x128xf32>
    %4 = vector.broadcast %3 : vector<1x128xf32> to vector<128x128xf32>
    %5 = arith.addf %2, %4 : vector<128x128xf32>
    %cst_5 = arith.constant 0.000000e+00 : f32
    %6 = vector.broadcast %cst_5 : f32 to vector<128x128xf32>
    %7 = arith.cmpf ogt, %5, %6 : vector<128x128xf32>
    %cst_6 = arith.constant 0.00999999977 : f32
    %8 = vector.broadcast %cst_6 : f32 to vector<128x128xf32>
    %9 = arith.mulf %8, %5 : vector<128x128xf32>
    %10 = arith.select %7, %5, %9 : vector<128x128xi1>, vector<128x128xf32>
    %11 = arith.truncf %10 : vector<128x128xf32> to vector<128x128xbf16>
    %c0_7 = arith.constant 0 : index
    %c0_8 = arith.constant 0 : index
    %12 = vector.load %arg4[%c0_7, %c0_8] : memref<128x128xbf16, #tpu.memory_space<vmem>>, vector<128x128xbf16>
    %cst_9 = arith.constant dense<0.000000e+00> : vector<128x128xf32>
    %13 = tpu.matmul %11, %12, %cst_9 {dimension_numbers = #tpu.dot_dimension_numbers<[1], [0], [0], [1], [0, 0, 1, 1], [], []>} : vector<128x128xbf16>, vector<128x128xbf16>, vector<128x128xf32> -> vector<128x128xf32>
    %c0_10 = arith.constant 0 : index
    %c0_11 = arith.constant 0 : index
    %14 = vector.load %arg5[%c0_10, %c0_11] : memref<1x128xf32, #tpu.memory_space<vmem>>, vector<1x128xf32>
    %15 = vector.broadcast %14 : vector<1x128xf32> to vector<128x128xf32>
    %16 = arith.addf %13, %15 : vector<128x128xf32>
    %cst_12 = arith.constant 0.000000e+00 : f32
    %17 = vector.broadcast %cst_12 : f32 to vector<128x128xf32>
    %18 = arith.cmpf ogt, %16, %17 : vector<128x128xf32>
    %cst_13 = arith.constant 0.00999999977 : f32
    %19 = vector.broadcast %cst_13 : f32 to vector<128x128xf32>
    %20 = arith.mulf %19, %16 : vector<128x128xf32>
    %21 = arith.select %18, %16, %20 : vector<128x128xi1>, vector<128x128xf32>
    %22 = arith.truncf %21 : vector<128x128xf32> to vector<128x128xbf16>
    %c0_14 = arith.constant 0 : index
    %c0_15 = arith.constant 0 : index
    %23 = vector.load %arg6[%c0_14, %c0_15] : memref<128x128xbf16, #tpu.memory_space<vmem>>, vector<128x128xbf16>
    %cst_16 = arith.constant dense<0.000000e+00> : vector<128x128xf32>
    %24 = tpu.matmul %22, %23, %cst_16 {dimension_numbers = #tpu.dot_dimension_numbers<[1], [0], [0], [1], [0, 0, 1, 1], [], []>} : vector<128x128xbf16>, vector<128x128xbf16>, vector<128x128xf32> -> vector<128x128xf32>
    %c0_17 = arith.constant 0 : index
    %c0_18 = arith.constant 0 : index
    %25 = vector.load %arg7[%c0_17, %c0_18] : memref<1x128xf32, #tpu.memory_space<vmem>>, vector<1x128xf32>
    %26 = vector.broadcast %25 : vector<1x128xf32> to vector<128x128xf32>
    %27 = arith.addf %24, %26 : vector<128x128xf32>
    %cst_19 = arith.constant 0.000000e+00 : f32
    %28 = vector.broadcast %cst_19 : f32 to vector<128x128xf32>
    %29 = arith.cmpf ogt, %27, %28 : vector<128x128xf32>
    %cst_20 = arith.constant 0.00999999977 : f32
    %30 = vector.broadcast %cst_20 : f32 to vector<128x128xf32>
    %31 = arith.mulf %30, %27 : vector<128x128xf32>
    %32 = arith.select %29, %27, %31 : vector<128x128xi1>, vector<128x128xf32>
    %33 = tpu.iota {dimensions = array<i32: 0>} : vector<128x128xi32>
    %c128_i32 = arith.constant 128 : i32
    %34 = arith.muli %arg0, %c128_i32 : i32
    %35 = vector.broadcast %34 : i32 to vector<128x128xi32>
    %36 = arith.addi %33, %35 : vector<128x128xi32>
    %c20_i32 = arith.constant 20 : i32
    %37 = vector.broadcast %c20_i32 : i32 to vector<128x128xi32>
    %38 = arith.cmpi slt, %36, %37 : vector<128x128xi32>
    %cst_21 = arith.constant 0.000000e+00 : f32
    %39 = vector.broadcast %cst_21 : f32 to vector<128x128xf32>
    %40 = arith.select %38, %32, %39 : vector<128x128xi1>, vector<128x128xf32>
    %cst_22 = arith.constant dense<0.000000e+00> : vector<128xf32>
    %41 = vector.multi_reduction <add>, %40, %cst_22 [0] : vector<128x128xf32> to vector<128xf32>
    %42 = vector.shape_cast %41 : vector<128xf32> to vector<1x128xf32>
    %c0_23 = arith.constant 0 : index
    %c0_24 = arith.constant 0 : index
    %c0_25 = arith.constant 0 : index
    %43 = vector.load %arg8[%c0_23, %c0_24, %c0_25] : memref<1x2x128xf32, #tpu.memory_space<vmem>>, vector<1x1x128xf32>
    %44 = vector.shape_cast %43 : vector<1x1x128xf32> to vector<1x128xf32>
    %45 = vector.shape_cast %42 : vector<1x128xf32> to vector<1x1x128xf32>
    tpu.vector_store %arg8[%c0_23, %c0_24, %c0_25], %45 {strides = array<i32>} : memref<1x2x128xf32, #tpu.memory_space<vmem>>, vector<1x1x128xf32>,
    %46 = arith.mulf %40, %40 : vector<128x128xf32>
    %cst_26 = arith.constant dense<0.000000e+00> : vector<128xf32>
    %47 = vector.multi_reduction <add>, %46, %cst_26 [0] : vector<128x128xf32> to vector<128xf32>
    %48 = vector.shape_cast %47 : vector<128xf32> to vector<1x128xf32>
    %c0_27 = arith.constant 0 : index
    %c1 = arith.constant 1 : index
    %c0_28 = arith.constant 0 : index
    %49 = vector.load %arg8[%c0_27, %c1, %c0_28] : memref<1x2x128xf32, #tpu.memory_space<vmem>>, vector<1x1x128xf32>
    %50 = vector.shape_cast %49 : vector<1x1x128xf32> to vector<1x128xf32>
    %51 = vector.shape_cast %48 : vector<1x128xf32> to vector<1x1x128xf32>
    tpu.vector_store %arg8[%c0_27, %c1, %c0_28], %51 {strides = array<i32>} : memref<1x2x128xf32, #tpu.memory_space<vmem>>, vector<1x1x128xf32>,
    return
  }
  func.func @transform_0(%arg0: i32) -> (i32, i32) {
    %c0_i32 = arith.constant 0 : i32
    %c0_i32_0 = arith.constant 0 : i32
    return %arg0, %c0_i32 : i32, i32
  }
  func.func @transform_1(%arg0: i32) -> (i32, i32) {
    %c0_i32 = arith.constant 0 : i32
    %c0_i32_0 = arith.constant 0 : i32
    %c0_i32_1 = arith.constant 0 : i32
    return %c0_i32, %c0_i32_0 : i32, i32
  }
  func.func @transform_2(%arg0: i32) -> (i32, i32) {
    %c0_i32 = arith.constant 0 : i32
    %c0_i32_0 = arith.constant 0 : i32
    %c0_i32_1 = arith.constant 0 : i32
    return %c0_i32, %c0_i32_0 : i32, i32
  }
  func.func @transform_3(%arg0: i32) -> (i32, i32) {
    %c0_i32 = arith.constant 0 : i32
    %c0_i32_0 = arith.constant 0 : i32
    %c0_i32_1 = arith.constant 0 : i32
    return %c0_i32, %c0_i32_0 : i32, i32
  }
  func.func @transform_4(%arg0: i32) -> (i32, i32) {
    %c0_i32 = arith.constant 0 : i32
    %c0_i32_0 = arith.constant 0 : i32
    %c0_i32_1 = arith.constant 0 : i32
    return %c0_i32, %c0_i32_0 : i32, i32
  }
  func.func @transform_5(%arg0: i32) -> (i32, i32) {
    %c0_i32 = arith.constant 0 : i32
    %c0_i32_0 = arith.constant 0 : i32
    %c0_i32_1 = arith.constant 0 : i32
    return %c0_i32, %c0_i32_0 : i32, i32
  }
  func.func @transform_6(%arg0: i32) -> (i32, i32) {
    %c0_i32 = arith.constant 0 : i32
    %c0_i32_0 = arith.constant 0 : i32
    %c0_i32_1 = arith.constant 0 : i32
    return %c0_i32, %c0_i32_0 : i32, i32
  }
  func.func @transform_7(%arg0: i32) -> (i32, i32, i32) {
    %c0_i32 = arith.constant 0 : i32
    %c0_i32_0 = arith.constant 0 : i32
    %c0_i32_1 = arith.constant 0 : i32
    return %arg0, %c0_i32, %c0_i32_0 : i32, i32, i32
  }
}

</mosaic_0001>

<bundles_post_ra>
// kernel: tpu_custom_call.1
= control target key start
LH: loop header
LB: loop body
LE: loop exit
PB: predicated region body
PF: predicated region fallthrough
CT: control target
= control target key end

     0   :  { %12 = vsyncpa [#allocation3], 0  ;;  %s1297_s0 = inlined_call_operand.vmem [shape: bf16[128,32], index: 0, kind: input, shape index: {}]   ;;  %s1298_s1 = inlined_call_operand.vmem [shape: bf16[32,128], index: 1, kind: input, shape index: {}]   ;;  %s1299_s2 = inlined_call_operand.vmem [shape: f32[1,128], index: 2, kind: input, shape index: {}]   ;;  %s1300_s3 = inlined_call_operand.vmem [shape: bf16[128,128], index: 3, kind: input, shape index: {}]   ;;  %s1301_s4 = inlined_call_operand.vmem [shape: f32[1,128], index: 4, kind: input, shape index: {}]   ;;  %s1302_s5 = inlined_call_operand.hbm [shape: bf16[128,128], index: 5, kind: input, shape index: {}]   ;;  %s1303_s6 = inlined_call_operand.vmem [shape: f32[1,128], index: 6, kind: input, shape index: {}]   ;;  %s1304_s7 = inlined_call_operand.hbm [shape: f32[1,2,128], index: 7, kind: output, shape index: {}]  }
   0x1   :  { %13 = vsyncpa [#allocation4], 0  ;;  %s1122_s24 = smov [#allocation2]   ;;  %s1074_s28 = scalar_lea.hbm %s1302_s5, 1024 }
   0x2   :  { %s29_s25 = sshll.u32 %s1122_s24, 4  ;;  %p1075_p0 = scmp.ne.s32.totalorder %s1302_s5, %s1074_s28  ;;  %s30_s25 = int_to_ptr.vmem [resolvable:$true] %s29_s25 }
   0x3   :  { %p1078_p1 = scmp.lt.u32.totalorder %s1074_s28, %s1302_s5 }
   0x5   :  { %p1080_p2 = pnand %p1078_p1, %p1075_p0 }
   0x7   :  { %1083 = shalt.err (!%p1080_p2)
}
   0x8   :  { %s1084_s10 = scalar_lea.vmem %s30_s25, 1024  ;;  %p1089_p4 = scmp.lt.s32.totalorder %s30_s25, %s30_s25 }
   0x9   :  { %p1085_p3 = scmp.ne.s32.totalorder %s30_s25, %s1084_s10  ;;  %p1090_p5 = scmp.lt.s32.totalorder %s1084_s10, %s1084_s10 }
   0xb   :  { %p1091_p6 = por %p1090_p5, %p1089_p4 }
   0xd   :  { %p1092_p7 = pnand %p1091_p6, %p1085_p3 }
   0xf   :  { %1095 = shalt.err (!%p1092_p7)
}
  0x10   :  { %s1123_s11 = smov 64   ;;  %s1124_s12 = smov 4  }
  0x11   :  { %35 = dma.hbm_to_vmem [thread:$0]  %s1302_s5, 1024, %s30_s25, [#allocation3], %s1123_s11, %s1123_s11, %s1124_s12  }
  0x12   :  { %1118 = dma.done.wait [#allocation3], 1024  }
  0x13   :  { %1119 = vsyncadd [#allocation3], 4294966272  ;;  %v1048_v0 = vld [vmem:[%s1298_s1] sm:$0xff]   ;;  %v1049_v1 = vld [vmem:[%s1298_s1 + $0x8] sm:$0xff]   ;;  %vm121_vm0 = vcmask 261120  }
  0x14   :  { %960 = vmatprep.subr.bf16.mxu0 %v1048_v0  ;;  %v1050_v2 = vld [vmem:[%s1297_s0] sm:$0xff]   ;;  %v1051_v3 = vld [vmem:[%s1297_s0 + $0x8] sm:$0xff]   ;;  %v1052_v4 = vld [vmem:[%s1297_s0 + $0x10] sm:$0xff]  }
  0x15   :  { %961 = vmatpush3.bf16.msra.mxu0 %v1048_v0  ;;  %964 = vmatprep.mubr.msk.bf16.mxu0 %vm121_vm0, %v1050_v2  ;;  %v1058_v5 = vld [vmem:[%s1300_s3] sm:$0xff]   ;;  %v1059_v6 = vld [vmem:[%s1300_s3 + $0x8] sm:$0xff]   ;;  %v1053_v7 = vld [vmem:[%s1297_s0 + $0x18] sm:$0xff]  }
  0x16   :  { %962 = vmatprep.subr.bf16.mxu0 %v1049_v1  ;;  %980 = vmatprep.subr.bf16.mxu1 %v1058_v5  ;;  %v1054_v8 = vld [vmem:[%s1297_s0 + $0x20] sm:$0xff]   ;;  %v1060_v9 = vld [vmem:[%s1300_s3 + $0x10] sm:$0xff]   ;;  %v1061_v10 = vld [vmem:[%s1300_s3 + $0x18] sm:$0xff]  }
  0x17   :  { %981 = vmatpush3.bf16.msra.mxu1 %v1058_v5  ;;  %v1055_v11 = vld [vmem:[%s1297_s0 + $0x28] sm:$0xff]   ;;  %v1062_v12 = vld [vmem:[%s1300_s3 + $0x20] sm:$0xff]   ;;  %v1056_v13 = vld [vmem:[%s1297_s0 + $0x30] sm:$0xff]  }
  0x18   :  { %982 = vmatprep.subr.bf16.mxu1 %v1059_v6  ;;  %v1057_v14 = vld [vmem:[%s1297_s0 + $0x38] sm:$0xff]   ;;  %v1063_v15 = vld [vmem:[%s1300_s3 + $0x28] sm:$0xff]   ;;  %v1064_v16 = vld [vmem:[%s1300_s3 + $0x30] sm:$0xff]  }
  0x19   :  { %963 = vmatpush3.bf16.msra.mxu0 %v1049_v1  ;;  %v1065_v17 = vld [vmem:[%s1300_s3 + $0x38] sm:$0xff]   ;;  %v1066_v18 = vld [vmem:[#allocation2] sm:$0xff]   ;;  %v1067_v19 = vld [vmem:[#allocation2 + $0x8] sm:$0xff]  }
  0x1a   :  { %1012 = vmatprep.subr.bf16.mxu0 %v1066_v18  ;;  %v1068_v20 = vld [vmem:[#allocation2 + $0x10] sm:$0xff]   ;;  %v1069_v21 = vld [vmem:[#allocation2 + $0x18] sm:$0xff]   ;;  %v1070_v22 = vld [vmem:[#allocation2 + $0x20] sm:$0xff]  }
  0x1b   :  { %983 = vmatpush3.bf16.msra.mxu1 %v1059_v6  ;;  %v1071_v23 = vld [vmem:[#allocation2 + $0x28] sm:$0xff]   ;;  %v1243_v24 = vld [vmem:[%s1299_s2] ss:$0 sm:$0xff] }
  0x1c   :  { %965 = vmatmul.mubr.msk.bf16.vlgmr.msra.gmra.mrb[0].mxu0 %vm121_vm0, %v1051_v3  ;;  %984 = vmatprep.subr.bf16.mxu1 %v1060_v9 }
  0x1d   :  { %968 = vmatprep.mubr.msk.bf16.mxu0 %vm121_vm0, %v1052_v4  ;;  %1013 = vmatpush3.bf16.msra.mxu0 %v1066_v18 }
  0x1e   :  { %1014 = vmatprep.subr.bf16.mxu0 %v1067_v19 }
  0x1f   :  { %985 = vmatpush3.bf16.msra.mxu1 %v1060_v9 }
  0x20   :  { %986 = vmatprep.subr.bf16.mxu1 %v1061_v10 }
  0x21   :  { %1015 = vmatpush3.bf16.msra.mxu0 %v1067_v19 }
  0x22   :  { %1016 = vmatprep.subr.bf16.mxu0 %v1068_v20 }
  0x23   :  { %987 = vmatpush3.bf16.msra.mxu1 %v1061_v10 }
  0x24   :  { %969 = vmatmul.mubr.msk.bf16.gmra.mrb[4].mxu0 %vm121_vm0, %v1053_v7  ;;  %988 = vmatprep.subr.bf16.mxu1 %v1062_v12 }
  0x25   :  { %972 = vmatprep.mubr.msk.bf16.mxu0 %vm121_vm0, %v1054_v8  ;;  %1017 = vmatpush3.bf16.msra.mxu0 %v1068_v20 }
  0x26   :  { %1018 = vmatprep.subr.bf16.mxu0 %v1069_v21 }
  0x27   :  { %989 = vmatpush3.bf16.msra.mxu1 %v1062_v12 }
  0x28   :  { %990 = vmatprep.subr.bf16.mxu1 %v1063_v15 }
  0x29   :  { %1019 = vmatpush3.bf16.msra.mxu0 %v1069_v21 }
  0x2a   :  { %1020 = vmatprep.subr.bf16.mxu0 %v1070_v22 }
  0x2b   :  { %991 = vmatpush3.bf16.msra.mxu1 %v1063_v15 }
  0x2c   :  { %973 = vmatmul.mubr.msk.bf16.gmra.mrb[8].mxu0 %vm121_vm0, %v1055_v11  ;;  %992 = vmatprep.subr.bf16.mxu1 %v1064_v16 }
  0x2d   :  { %976 = vmatprep.mubr.msk.bf16.mxu0 %vm121_vm0, %v1056_v13  ;;  %1021 = vmatpush3.bf16.msra.mxu0 %v1070_v22 }
  0x2e   :  { %1022 = vmatprep.subr.bf16.mxu0 %v1071_v23 }
  0x2f   :  { %993 = vmatpush3.bf16.msra.mxu1 %v1064_v16 }
  0x30   :  { %994 = vmatprep.subr.bf16.mxu1 %v1065_v17 }
  0x31   :  { %1023 = vmatpush3.bf16.msra.mxu0 %v1071_v23 }
  0x33   :  { %995 = vmatpush3.bf16.msra.mxu1 %v1065_v17 }
  0x34   :  { %977 = vmatmul.mubr.msk.bf16.gmra.mrb[12].mxu0 %vm121_vm0, %v1057_v14 }
  0xef   :  { %v966_v25 = vpop.f32.mrb[0].mxu0 }
  0xf0   :  { %v189_v26 = vadd.f32 %v966_v25, %v1243_v24  ;;  %v180_v27 = vpop.f32.mrb[1].mxu0 }
  0xf1   :  { %v181_v28 = vadd.f32 %v1243_v24, %v180_v27  ;;  %v967_v29 = vpop.f32.mrb[2].mxu0 }
  0xf2   :  { %v261_v30 = vmul.f32 0.01, %v189_v26  ;;  %v192_v31 = vadd.f32 %v967_v29, %v1243_v24  ;;  %v183_v32 = vpop.f32.mrb[3].mxu0  ;;  %vm245_vm1 = vcmp.gt.f32.partialorder %v189_v26, 0.0 }
  0xf3   :  { %v259_v33 = vmul.f32 0.01, %v181_v28  ;;  %v184_v34 = vadd.f32 %v1243_v24, %v183_v32  ;;  %vm243_vm3 = vcmp.gt.f32.partialorder %v181_v28, 0.0 }
  0xf4   :  { %vm246_vm2 = vcmp.gt.f32.partialorder %v192_v31, 0.0  ;;  %v262_v35 = vmul.f32 0.01, %v192_v31  ;;  %v277_v37 = vsel %vm245_vm1, %v189_v26, %v261_v30 }
  0xf5   :  { %v260_v36 = vmul.f32 0.01, %v184_v34  ;;  %vm244_vm4 = vcmp.gt.f32.partialorder %v184_v34, 0.0  ;;  %v275_v40 = vsel %vm243_vm3, %v181_v28, %v259_v33 }
  0xf6   :  { %v278_v38 = vsel %vm246_vm2, %v192_v31, %v262_v35  ;;  %v1073_v35 = vld [vmem:[#allocation2 + $0x38] sm:$0xff]  }
  0xf7   :  { %v970_v39 = vpop.f32.mrb[4].mxu0  ;;  %v276_v41 = vsel %vm244_vm4, %v184_v34, %v260_v36  ;;  %v292_v42 = vpack.c.bf16 %v278_v38, %v277_v37  ;;  %v1072_v34 = vld [vmem:[#allocation2 + $0x30] sm:$0xff]  }
  0xf8   :  { %v205_v43 = vadd.f32 %v970_v39, %v1243_v24  ;;  %v196_v44 = vpop.f32.mrb[5].mxu0  ;;  %v291_v45 = vpack.c.bf16 %v276_v41, %v275_v40  ;;  %1024 = vmatprep.subr.bf16.mxu0 %v1072_v34 }
  0xf9   :  { %v197_v46 = vadd.f32 %v1243_v24, %v196_v44  ;;  %v971_v47 = vpop.f32.mrb[6].mxu0  ;;  %1025 = vmatpush3.bf16.msra.mxu0 %v1072_v34 }
  0xfa   :  { %v265_v48 = vmul.f32 0.01, %v205_v43  ;;  %v208_v49 = vadd.f32 %v971_v47, %v1243_v24  ;;  %v199_v50 = vpop.f32.mrb[7].mxu0  ;;  %996 = vmatprep.mubr.bf16.mxu1 %v291_v45  ;;  %vm249_vm5 = vcmp.gt.f32.partialorder %v205_v43, 0.0  ;;  %1026 = vmatprep.subr.bf16.mxu0 %v1073_v35 }
  0xfb   :  { %v263_v51 = vmul.f32 0.01, %v197_v46  ;;  %v200_v52 = vadd.f32 %v1243_v24, %v199_v50  ;;  %997 = vmatmul.mubr.bf16.vlgmr.msra.gmra.mrb[0].mxu1 %v292_v42  ;;  %vm247_vm6 = vcmp.gt.f32.partialorder %v197_v46, 0.0 }
  0xfc   :  { %vm250_vm7 = vcmp.gt.f32.partialorder %v208_v49, 0.0  ;;  %v266_v53 = vmul.f32 0.01, %v208_v49  ;;  %v281_v55 = vsel %vm249_vm5, %v205_v43, %v265_v48 }
  0xfd   :  { %vm248_vm8 = vcmp.gt.f32.partialorder %v200_v52, 0.0  ;;  %v264_v54 = vmul.f32 0.01, %v200_v52  ;;  %v279_v58 = vsel %vm247_vm6, %v197_v46, %v263_v51  ;;  %1027 = vmatpush3.bf16.msra.mxu0 %v1073_v35 }
  0xfe   :  { %v282_v56 = vsel %vm250_vm7, %v208_v49, %v266_v53 }
  0xff   :  { %v974_v57 = vpop.f32.mrb[8].mxu0  ;;  %v280_v59 = vsel %vm248_vm8, %v200_v52, %v264_v54  ;;  %v294_v60 = vpack.c.bf16 %v282_v56, %v281_v55 }
 0x100   :  { %v221_v61 = vadd.f32 %v974_v57, %v1243_v24  ;;  %v212_v62 = vpop.f32.mrb[9].mxu0  ;;  %v293_v63 = vpack.c.bf16 %v280_v59, %v279_v58 }
 0x101   :  { %v213_v0 = vadd.f32 %v1243_v24, %v212_v62  ;;  %v975_v1 = vpop.f32.mrb[10].mxu0 }
 0x102   :  { %v269_v2 = vmul.f32 0.01, %v221_v61  ;;  %v224_v3 = vadd.f32 %v975_v1, %v1243_v24  ;;  %v215_v4 = vpop.f32.mrb[11].mxu0  ;;  %1000 = vmatprep.mubr.bf16.mxu1 %v293_v63  ;;  %vm253_vm9 = vcmp.gt.f32.partialorder %v221_v61, 0.0 }
 0x103   :  { %v267_v5 = vmul.f32 0.01, %v213_v0  ;;  %v216_v6 = vadd.f32 %v1243_v24, %v215_v4  ;;  %1001 = vmatmul.mubr.bf16.gmra.mrb[4].mxu1 %v294_v60  ;;  %vm251_vm10 = vcmp.gt.f32.partialorder %v213_v0, 0.0 }
 0x104   :  { %vm254_vm11 = vcmp.gt.f32.partialorder %v224_v3, 0.0  ;;  %v270_v7 = vmul.f32 0.01, %v224_v3  ;;  %v285_v9 = vsel %vm253_vm9, %v221_v61, %v269_v2 }
 0x105   :  { %vm252_vm12 = vcmp.gt.f32.partialorder %v216_v6, 0.0  ;;  %v268_v8 = vmul.f32 0.01, %v216_v6  ;;  %v283_v12 = vsel %vm251_vm10, %v213_v0, %v267_v5 }
 0x106   :  { %v286_v10 = vsel %vm254_vm11, %v224_v3, %v270_v7 }
 0x107   :  { %v978_v11 = vpop.f32.mrb[12].mxu0  ;;  %v284_v13 = vsel %vm252_vm12, %v216_v6, %v268_v8  ;;  %v296_v14 = vpack.c.bf16 %v286_v10, %v285_v9 }
 0x108   :  { %v237_v15 = vadd.f32 %v978_v11, %v1243_v24  ;;  %v228_v16 = vpop.f32.mrb[13].mxu0  ;;  %v295_v17 = vpack.c.bf16 %v284_v13, %v283_v12 }
 0x109   :  { %v229_v18 = vadd.f32 %v1243_v24, %v228_v16  ;;  %v979_v19 = vpop.f32.mrb[14].mxu0 }
 0x10a   :  { %v273_v20 = vmul.f32 0.01, %v237_v15  ;;  %v240_v21 = vadd.f32 %v979_v19, %v1243_v24  ;;  %v231_v22 = vpop.f32.mrb[15].mxu0  ;;  %1004 = vmatprep.mubr.bf16.mxu1 %v295_v17  ;;  %vm257_vm13 = vcmp.gt.f32.partialorder %v237_v15, 0.0 }
 0x10b   :  { %v271_v23 = vmul.f32 0.01, %v229_v18  ;;  %v232_v25 = vadd.f32 %v1243_v24, %v231_v22  ;;  %1005 = vmatmul.mubr.bf16.gmra.mrb[8].mxu1 %v296_v14  ;;  %vm255_vm14 = vcmp.gt.f32.partialorder %v229_v18, 0.0  ;;  %v1264_v24 = vld [vmem:[%s1301_s4] ss:$0 sm:$0xff] }
 0x10c   :  { %vm258_vm15 = vcmp.gt.f32.partialorder %v240_v21, 0.0  ;;  %v274_v26 = vmul.f32 0.01, %v240_v21  ;;  %v289_v28 = vsel %vm257_vm13, %v237_v15, %v273_v20 }
 0x10d   :  { %vm256_vm0 = vcmp.gt.f32.partialorder %v232_v25, 0.0  ;;  %v272_v27 = vmul.f32 0.01, %v232_v25  ;;  %v287_v30 = vsel %vm255_vm14, %v229_v18, %v271_v23 }
 0x10e   :  { %v290_v29 = vsel %vm258_vm15, %v240_v21, %v274_v26 }
 0x10f   :  { %v288_v31 = vsel %vm256_vm0, %v232_v25, %v272_v27  ;;  %v298_v32 = vpack.c.bf16 %v290_v29, %v289_v28 }
 0x110   :  { %v297_v33 = vpack.c.bf16 %v288_v31, %v287_v30 }
 0x112   :  { %1008 = vmatprep.mubr.bf16.mxu1 %v297_v33 }
 0x113   :  { %1009 = vmatmul.mubr.bf16.gmra.mrb[12].mxu1 %v298_v32 }
 0x1ce   :  { %v998_v36 = vpop.f32.mrb[0].mxu1 }
 0x1cf   :  { %v413_v37 = vadd.f32 %v998_v36, %v1264_v24  ;;  %v404_v38 = vpop.f32.mrb[1].mxu1 }
 0x1d0   :  { %v405_v39 = vadd.f32 %v1264_v24, %v404_v38  ;;  %v999_v40 = vpop.f32.mrb[2].mxu1 }
 0x1d1   :  { %v485_v41 = vmul.f32 0.01, %v413_v37  ;;  %v416_v42 = vadd.f32 %v999_v40, %v1264_v24  ;;  %v407_v43 = vpop.f32.mrb[3].mxu1  ;;  %vm469_vm1 = vcmp.gt.f32.partialorder %v413_v37, 0.0 }
 0x1d2   :  { %v483_v44 = vmul.f32 0.01, %v405_v39  ;;  %v408_v45 = vadd.f32 %v1264_v24, %v407_v43  ;;  %vm467_vm2 = vcmp.gt.f32.partialorder %v405_v39, 0.0 }
 0x1d3   :  { %vm470_vm3 = vcmp.gt.f32.partialorder %v416_v42, 0.0  ;;  %v486_v46 = vmul.f32 0.01, %v416_v42  ;;  %v501_v48 = vsel %vm469_vm1, %v413_v37, %v485_v41 }
 0x1d4   :  { %vm468_vm4 = vcmp.gt.f32.partialorder %v408_v45, 0.0  ;;  %v484_v47 = vmul.f32 0.01, %v408_v45  ;;  %v499_v52 = vsel %vm467_vm2, %v405_v39, %v483_v44 }
 0x1d5   :  { %v502_v49 = vsel %vm470_vm3, %v416_v42, %v486_v46 }
 0x1d6   :  { %v516_v50 = vpack.c.bf16 %v502_v49, %v501_v48  ;;  %v1002_v51 = vpop.f32.mrb[4].mxu1  ;;  %v500_v53 = vsel %vm468_vm4, %v408_v45, %v484_v47  ;;  %v739_v45 = vlaneseq }
 0x1d7   :  { %v429_v54 = vadd.f32 %v1002_v51, %v1264_v24  ;;  %v420_v55 = vpop.f32.mrb[5].mxu1  ;;  %v515_v56 = vpack.c.bf16 %v500_v53, %v499_v52 }
 0x1d8   :  { %v421_v57 = vadd.f32 %v1264_v24, %v420_v55  ;;  %v1003_v58 = vpop.f32.mrb[6].mxu1  ;;  %v740_v46 = vshrl.u32 %v739_v45, 7 }
 0x1d9   :  { %v489_v59 = vmul.f32 0.01, %v429_v54  ;;  %v432_v60 = vadd.f32 %v1003_v58, %v1264_v24  ;;  %v423_v61 = vpop.f32.mrb[7].mxu1  ;;  %1028 = vmatprep.mubr.bf16.mxu0 %v515_v56  ;;  %vm473_vm5 = vcmp.gt.f32.partialorder %v429_v54, 0.0 }
 0x1da   :  { %v487_v62 = vmul.f32 0.01, %v421_v57  ;;  %v424_v63 = vadd.f32 %v1264_v24, %v423_v61  ;;  %1029 = vmatmul.mubr.bf16.vlgmr.msra.gmra.mrb[16].mxu0 %v516_v50  ;;  %vm471_vm6 = vcmp.gt.f32.partialorder %v421_v57, 0.0  ;;  %v742_v49 = vadd.s32 16, %v740_v46 }
 0x1db   :  { %vm474_vm7 = vcmp.gt.f32.partialorder %v432_v60, 0.0  ;;  %v490_v0 = vmul.f32 0.01, %v432_v60  ;;  %v505_v2 = vsel %vm473_vm5, %v429_v54, %v489_v59 }
 0x1dc   :  { %vm472_vm8 = vcmp.gt.f32.partialorder %v424_v63, 0.0  ;;  %v488_v1 = vmul.f32 0.01, %v424_v63  ;;  %v503_v5 = vsel %vm471_vm6, %v421_v57, %v487_v62  ;;  %vm776_vm3 = vcmp.lt.s32.totalorder %v742_v49, 20 }
 0x1dd   :  { %v506_v3 = vsel %vm474_vm7, %v432_v60, %v490_v0 }
 0x1de   :  { %v1006_v4 = vpop.f32.mrb[8].mxu1  ;;  %v504_v6 = vsel %vm472_vm8, %v424_v63, %v488_v1  ;;  %v518_v7 = vpack.c.bf16 %v506_v3, %v505_v2 }
 0x1df   :  { %v445_v8 = vadd.f32 %v1006_v4, %v1264_v24  ;;  %v436_v9 = vpop.f32.mrb[9].mxu1  ;;  %v517_v10 = vpack.c.bf16 %v504_v6, %v503_v5 }
 0x1e0   :  { %v437_v11 = vadd.f32 %v1264_v24, %v436_v9  ;;  %v1007_v12 = vpop.f32.mrb[10].mxu1 }
 0x1e1   :  { %v493_v13 = vmul.f32 0.01, %v445_v8  ;;  %v448_v14 = vadd.f32 %v1007_v12, %v1264_v24  ;;  %v439_v15 = vpop.f32.mrb[11].mxu1  ;;  %1032 = vmatprep.mubr.bf16.mxu0 %v517_v10  ;;  %vm477_vm9 = vcmp.gt.f32.partialorder %v445_v8, 0.0 }
 0x1e2   :  { %v491_v16 = vmul.f32 0.01, %v437_v11  ;;  %v440_v17 = vadd.f32 %v1264_v24, %v439_v15  ;;  %1033 = vmatmul.mubr.bf16.gmra.mrb[20].mxu0 %v518_v7  ;;  %vm475_vm10 = vcmp.gt.f32.partialorder %v437_v11, 0.0 }
 0x1e3   :  { %vm478_vm11 = vcmp.gt.f32.partialorder %v448_v14, 0.0  ;;  %v494_v18 = vmul.f32 0.01, %v448_v14  ;;  %v509_v20 = vsel %vm477_vm9, %v445_v8, %v493_v13 }
 0x1e4   :  { %vm476_vm12 = vcmp.gt.f32.partialorder %v440_v17, 0.0  ;;  %v492_v19 = vmul.f32 0.01, %v440_v17  ;;  %v507_v23 = vsel %vm475_vm10, %v437_v11, %v491_v16 }
 0x1e5   :  { %v510_v21 = vsel %vm478_vm11, %v448_v14, %v494_v18 }
 0x1e6   :  { %v1010_v22 = vpop.f32.mrb[12].mxu1  ;;  %v508_v25 = vsel %vm476_vm12, %v440_v17, %v492_v19  ;;  %v520_v26 = vpack.c.bf16 %v510_v21, %v509_v20 }
 0x1e7   :  { %v461_v27 = vadd.f32 %v1010_v22, %v1264_v24  ;;  %v452_v28 = vpop.f32.mrb[13].mxu1  ;;  %v519_v29 = vpack.c.bf16 %v508_v25, %v507_v23 }
 0x1e8   :  { %v453_v30 = vadd.f32 %v1264_v24, %v452_v28  ;;  %v1011_v31 = vpop.f32.mrb[14].mxu1 }
 0x1e9   :  { %v497_v32 = vmul.f32 0.01, %v461_v27  ;;  %v464_v33 = vadd.f32 %v1011_v31, %v1264_v24  ;;  %v455_v34 = vpop.f32.mrb[15].mxu1  ;;  %1036 = vmatprep.mubr.bf16.mxu0 %v519_v29  ;;  %vm481_vm13 = vcmp.gt.f32.partialorder %v461_v27, 0.0 }
 0x1ea   :  { %v495_v35 = vmul.f32 0.01, %v453_v30  ;;  %v456_v36 = vadd.f32 %v1264_v24, %v455_v34  ;;  %1037 = vmatmul.mubr.bf16.gmra.mrb[24].mxu0 %v520_v26  ;;  %vm479_vm14 = vcmp.gt.f32.partialorder %v453_v30, 0.0  ;;  %v909_v24 = vld [vmem:[%s1303_s6] ss:$0 sm:$0xff]  ;;  %s1125_s6 = smov [#allocation5]  }
 0x1eb   :  { %vm482_vm15 = vcmp.gt.f32.partialorder %v464_v33, 0.0  ;;  %v498_v37 = vmul.f32 0.01, %v464_v33  ;;  %v513_v39 = vsel %vm481_vm13, %v461_v27, %v497_v32  ;;  %s872_s26 = sshll.u32 %s1125_s6, 4  ;;  %s873_s26 = int_to_ptr.vmem [resolvable:$true] %s872_s26 }
 0x1ec   :  { %vm480_vm0 = vcmp.gt.f32.partialorder %v456_v36, 0.0  ;;  %v496_v38 = vmul.f32 0.01, %v456_v36  ;;  %v511_v41 = vsel %vm479_vm14, %v453_v30, %v495_v35  ;;  %s1096_s27 = scalar_lea.vmem %s873_s26, 32  ;;  %p1101_p9 = scmp.lt.s32.totalorder %s873_s26, %s873_s26 }
 0x1ed   :  { %v514_v40 = vsel %vm482_vm15, %v464_v33, %v498_v37  ;;  %p1097_p8 = scmp.ne.s32.totalorder %s873_s26, %s1096_s27  ;;  %p1102_p10 = scmp.lt.s32.totalorder %s1096_s27, %s1096_s27 }
 0x1ee   :  { %v512_v42 = vsel %vm480_vm0, %v456_v36, %v496_v38  ;;  %v522_v43 = vpack.c.bf16 %v514_v40, %v513_v39 }
 0x1ef   :  { %v521_v44 = vpack.c.bf16 %v512_v42, %v511_v41  ;;  %p1103_p11 = por %p1102_p10, %p1101_p9 }
 0x1f1   :  { %1040 = vmatprep.mubr.bf16.mxu0 %v521_v44  ;;  %p1104_p12 = pnand %p1103_p11, %p1097_p8 }
 0x1f2   :  { %1041 = vmatmul.mubr.bf16.gmra.mrb[28].mxu0 %v522_v43 }
 0x2ad   :  { %v1030_v47 = vpop.f32.mrb[16].mxu0 }
 0x2ae   :  { %v637_v48 = vadd.f32 %v1030_v47, %v909_v24  ;;  %v628_v50 = vpop.f32.mrb[17].mxu0 }
 0x2af   :  { %v629_v51 = vadd.f32 %v909_v24, %v628_v50  ;;  %v1031_v52 = vpop.f32.mrb[18].mxu0 }
 0x2b0   :  { %vm693_vm1 = vcmp.gt.f32.partialorder %v637_v48, 0.0  ;;  %v709_v53 = vmul.f32 0.01, %v637_v48  ;;  %v631_v54 = vpop.f32.mrb[19].mxu0 }
 0x2b1   :  { %vm691_vm2 = vcmp.gt.f32.partialorder %v629_v51, 0.0  ;;  %v707_v55 = vmul.f32 0.01, %v629_v51  ;;  %v632_v56 = vadd.f32 %v909_v24, %v631_v54 }
 0x2b2   :  { %v725_v57 = vsel %vm693_vm1, %v637_v48, %v709_v53 }
 0x2b3   :  { %v723_v58 = vsel %vm691_vm2, %v629_v51, %v707_v55  ;;  %vm692_vm4 = vcmp.gt.f32.partialorder %v632_v56, 0.0  ;;  %v708_v59 = vmul.f32 0.01, %v632_v56  ;;  %v792_v60 = vsel %vm776_vm3, %v725_v57, 0.0 }
 0x2b4   :  { %v828_v63 = vmul.f32 %v723_v58, %v723_v58  ;;  %v830_v4 = vmul.f32 %v792_v60, %v792_v60 }
 0x2b5   :  { %v724_v61 = vsel %vm692_vm4, %v632_v56, %v708_v59  ;;  %v1034_v62 = vpop.f32.mrb[20].mxu0 }
 0x2b6   :  { %v806_v0 = vadd.f32 %v724_v61, %v723_v58  ;;  %v829_v1 = vmul.f32 %v724_v61, %v724_v61  ;;  %v644_v2 = vpop.f32.mrb[21].mxu0 }
 0x2b7   :  { %v1035_v3 = vpop.f32.mrb[22].mxu0 }
 0x2b8   :  { %v807_v5 = vadd.f32 %v806_v0, %v792_v60  ;;  %v844_v6 = vadd.f32 %v829_v1, %v828_v63  ;;  %v647_v7 = vpop.f32.mrb[23].mxu0 }
 0x2ba   :  { %v821_v8 = vrot.slane %v807_v5, 4  ;;  %v845_v9 = vadd.f32 %v844_v6, %v830_v4 }
 0x2bc   :  { %v822_v10 = vadd.f32 %v821_v8, %v807_v5  ;;  %v859_v11 = vrot.slane %v845_v9, 4 }
 0x2bd   :  { %v1038_v12 = vpop.f32.mrb[24].mxu0 }
 0x2be   :  { %v660_v13 = vpop.f32.mrb[25].mxu0  ;;  %v823_v14 = vrot.slane %v822_v10, 2  ;;  %v860_v15 = vadd.f32 %v859_v11, %v845_v9 }
 0x2bf   :  { %v1039_v16 = vpop.f32.mrb[26].mxu0 }
 0x2c0   :  { %v663_v17 = vpop.f32.mrb[27].mxu0  ;;  %v824_v18 = vadd.f32 %v823_v14, %v822_v10  ;;  %v861_v19 = vrot.slane %v860_v15, 2 }
 0x2c2   :  { %v825_v20 = vrot.slane %v824_v18, 1  ;;  %v862_v21 = vadd.f32 %v861_v19, %v860_v15 }
 0x2c4   :  { %v826_v22 = vadd.f32 %v825_v20, %v824_v18  ;;  %v863_v23 = vrot.slane %v862_v21, 1 }
 0x2c5   :  { %v1042_v25 = vpop.f32.mrb[28].mxu0 }
 0x2c6   :  { %v676_v26 = vpop.f32.mrb[29].mxu0  ;;  %827 = vst [vmem:[#allocation5] sm:$0x1] %v826_v22  ;;  %v864_v27 = vadd.f32 %v863_v23, %v862_v21 }
 0x2c7   :  { %v1043_v28 = vpop.f32.mrb[30].mxu0 }
 0x2c8   :  { %v679_v29 = vpop.f32.mrb[31].mxu0  ;;  %865 = vst [vmem:[#allocation5 + $0x1] sm:$0x1] %v864_v27 }
 0x2c9   :  { %1107 = shalt.err (!%p1104_p12)
}
 0x2ca   :  { %s1108_s30 = scalar_lea.hbm %s1304_s7, 32 }
 0x2cb   :  { %p1109_p13 = scmp.ne.s32.totalorder %s1304_s7, %s1108_s30  ;;  %p1112_p0 = scmp.lt.u32.totalorder %s1108_s30, %s1304_s7 }
 0x2cd   :  { %p1114_p1 = pnand %p1112_p0, %p1109_p13 }
 0x2cf   :  { %1117 = shalt.err (!%p1114_p1)
}
 0x2d0   :  { %875 = dma.vmem_to_hbm [thread:$0]  %s873_s26, 32, %s1304_s7, [#allocation4]  }
 0x2d1   :  { %1120 = dma.done.wait [#allocation4], 32  }
 0x2d2   :  { %1121 = vsyncadd [#allocation4], 4294967264 }
 0x2d3   :  { %879 = vsyncpa [#allocation3], 1 }
 0x2d4   :  { %880 = vsyncpa [#allocation4], 1 }

</bundles_post_ra>
